<compile_context>
chip_gen: v7x
topology: tpu7x:2x2x1
jax: 0.10.0
libtpu: 0.0.40
codegen_flags: <defaults>
</compile_context>

<pallas_src>
import jax
import jax.numpy as jnp
from jax.experimental import pallas as pl
from jax.experimental.pallas import tpu as pltpu


def _round_up(n, m):
    return ((n + m - 1) // m) * m


def _cdiv(a, b):
    return (a + b - 1) // b


def actor_mlp_kernel(x_ref, w1_ref, b1_ref, w2_ref, b2_ref, w3_ref, b3_ref, o_ref):
    # Layer 1: [TB, obs_dim] (cast to bf16) @ [obs_dim, 128] (bf16) -> f32 acc.
    x = x_ref[...].astype(jnp.bfloat16)
    h1 = jnp.dot(x, w1_ref[...], preferred_element_type=jnp.float32)
    h1 = jnp.maximum(h1 + b1_ref[...], 0.0)
    # Layer 2: bf16 MXU pass, f32 accumulation; bias/ReLU in f32.
    h2 = jnp.dot(h1.astype(jnp.bfloat16), w2_ref[...],
                 preferred_element_type=jnp.float32)
    h2 = jnp.maximum(h2 + b2_ref[...], 0.0)
    # Output layer: [TB, 128] @ [128, act_dim] -> right-sized (masked) store.
    logits = jnp.dot(h2.astype(jnp.bfloat16), w3_ref[...],
                     preferred_element_type=jnp.float32)
    o_ref[...] = (logits + b3_ref[...]).astype(o_ref.dtype)


def prepare_actor_params(params):
    """One-time prep: cast weights to bf16 (MXU inputs), keep biases f32.

    Call once outside the rollout/training loop and reuse the result; this is
    what removes the per-call pad/cast launches flagged in the review.
    """
    return {
        "w1": params["w1"].astype(jnp.bfloat16),
        "w2": params["w2"].astype(jnp.bfloat16),
        "w3": params["w3"].astype(jnp.bfloat16),
        "b1": params["b1"].astype(jnp.float32),
        "b2": params["b2"].astype(jnp.float32),
        "b3": params["b3"].astype(jnp.float32),
    }


def _actor_forward_xla(x, prep):
    """Fused XLA path for tiny batches (a Pallas launch is pure overhead there)."""
    h1 = jnp.maximum(x @ prep["w1"] + prep["b1"], 0.0)
    h2 = jnp.maximum(h1 @ prep["w2"] + prep["b2"], 0.0)
    return h2 @ prep["w3"] + prep["b3"]


def actor_forward(x, prep, *, tile_b=None, force_pallas=False):
    """x: [B, obs_dim] float32. prep: output of prepare_actor_params (bf16 W, f32 b)."""
    B, obs_dim = x.shape
    w1, b1 = prep["w1"], prep["b1"]   # [obs_dim, 128], [1, 128]
    w2, b2 = prep["w2"], prep["b2"]   # [128, 128],     [1, 128]
    w3, b3 = prep["w3"], prep["b3"]   # [128, act_dim], [1, act_dim]
    hidden = w1.shape[1]
    act_dim = w3.shape[1]

    # Crossover re-benchmarked conceptually: with no wrapper prep/slice passes
    # the Pallas path wins much earlier; keep a small fused-XLA fallback.
    if not force_pallas and B <= 32:
        return _actor_forward_xla(x, prep)

    if tile_b is None:
        tile_b = 1024                 # amortize ~0.35us/step grid overhead
    # Cap the tile so (a) tiny batches don't compute huge tiles and
    # (b) large batches always yield >= 2 grid steps (v7x: 2 TensorCores).
    tile_b = max(8, min(tile_b, _round_up(_cdiv(B, 2), 8)))
    grid = (_cdiv(B, tile_b),)        # ragged last block masked by Pallas

    # Weights/biases: block index never changes across the grid, so Pallas
    # keeps them VMEM-resident (a few tens of KB).
    # TODO(synk): pipeline_mode=pl.Buffered(1) on the weight specs would skip
    # their useless double-buffering; omitted here to keep lowering conservative.
    const = lambda shape: pl.BlockSpec(shape, lambda i: (0,) * len(shape))

    out = pl.pallas_call(
        actor_mlp_kernel,
        out_shape=jax.ShapeDtypeStruct((B, act_dim), jnp.float32),
        grid_spec=pltpu.PrefetchScalarGridSpec(
            num_scalar_prefetch=0,
            grid=grid,
            in_specs=[
                pl.BlockSpec((tile_b, obs_dim), lambda i: (i, 0)),  # x tile (f32)
                const(w1.shape), const(b1.shape),
                const(w2.shape), const(b2.shape),
                const(w3.shape), const(b3.shape),
            ],
            out_specs=pl.BlockSpec((tile_b, act_dim), lambda i: (i, 0)),
        ),
        compiler_params=pltpu.CompilerParams(
            dimension_semantics=("parallel",),        # batch axis -> both TCs on v7x
            vmem_limit_bytes=32 * 1024 * 1024,        # headroom under v7x's 64 MiB VMEM
        ),
    )(x, w1, b1, w2, b2, w3, b3)

    return out


def init_actor_params(key, obs_dim, act_dim, hidden=128):
    """Deterministic init mirroring nn.Linear default (uniform +/- 1/sqrt(fan_in)).
    Weights stored transposed as [in, out]."""
    keys = jax.random.split(key, 6)

    def linear(kw, kb, fan_in, fan_out):
        bound = 1.0 / jnp.sqrt(jnp.float32(fan_in))
        w = jax.random.uniform(kw, (fan_in, fan_out), jnp.float32, -bound, bound)
        b = jax.random.uniform(kb, (1, fan_out), jnp.float32, -bound, bound)
        return w, b

    w1, b1 = linear(keys[0], keys[1], obs_dim, hidden)
    w2, b2 = linear(keys[2], keys[3], hidden, hidden)
    w3, b3 = linear(keys[4], keys[5], hidden, act_dim)
    return {"w1": w1, "b1": b1, "w2": w2, "b2": b2, "w3": w3, "b3": b3}


if __name__ == "__main__":
    key = jax.random.PRNGKey(0)
    k_params, k_x1, k_x2 = jax.random.split(key, 3)

    obs_dim, act_dim = 32, 8
    params = init_actor_params(k_params, obs_dim, act_dim)
    prep = prepare_actor_params(params)      # one-time weight prep (bf16 cast)

    def ref_forward(x):
        h1 = jnp.maximum(x @ params["w1"] + params["b1"], 0.0)
        h2 = jnp.maximum(h1 @ params["w2"] + params["b2"], 0.0)
        return h2 @ params["w3"] + params["b3"]

    # Small demo batch (forces the Pallas path; tile_b is capped at 8 rows).
    x_small = jax.random.normal(k_x1, (8, obs_dim), jnp.float32)
    out_small = jax.block_until_ready(actor_forward(x_small, prep, force_pallas=True))
    assert out_small.shape == (8, act_dim)
    assert jnp.allclose(out_small, ref_forward(x_small), atol=5e-2, rtol=5e-2)

    # Larger batch exercising a ragged multi-block grid (2 tiles of 152 rows,
    # last block masked: 300 = 152 + 148).
    x_big = jax.random.normal(k_x2, (300, obs_dim), jnp.float32)
    out_big = jax.block_until_ready(actor_forward(x_big, prep))
    assert out_big.shape == (300, act_dim)
    assert jnp.allclose(out_big, ref_forward(x_big), atol=5e-2, rtol=5e-2)

    print("KERNEL_OK")
</pallas_src>

<mosaic_0001>
module attributes {stable_mosaic.version = 11 : i64} {
  func.func @actor_mlp_kernel(%arg0: i32, %arg1: memref<8x32xf32, #tpu.memory_space<vmem>>, %arg2: memref<32x128xbf16, #tpu.memory_space<vmem>>, %arg3: memref<1x128xf32, #tpu.memory_space<vmem>>, %arg4: memref<128x128xbf16, #tpu.memory_space<vmem>>, %arg5: memref<1x128xf32, #tpu.memory_space<vmem>>, %arg6: memref<128x8xbf16, #tpu.memory_space<vmem>>, %arg7: memref<1x8xf32, #tpu.memory_space<vmem>>, %arg8: memref<8x8xf32, #tpu.memory_space<vmem>>) attributes {dimension_semantics = [#tpu.dimension_semantics<parallel>], iteration_bounds = array<i64: 1>, scalar_prefetch = 0 : i64, scratch_operands = 0 : i64, tpu.core_type = #tpu.core_type<tc>, window_params = [{transform_indices = @transform_0, window_bounds = array<i64: 8, 32>}, {pipeline_mode = #tpu.pipeline_mode<synchronous>, transform_indices = @transform_1, window_bounds = array<i64: 32, 128>}, {pipeline_mode = #tpu.pipeline_mode<synchronous>, transform_indices = @transform_2, window_bounds = array<i64: 1, 128>}, {pipeline_mode = #tpu.pipeline_mode<synchronous>, transform_indices = @transform_3, window_bounds = array<i64: 128, 128>}, {pipeline_mode = #tpu.pipeline_mode<synchronous>, transform_indices = @transform_4, window_bounds = array<i64: 1, 128>}, {pipeline_mode = #tpu.pipeline_mode<synchronous>, transform_indices = @transform_5, window_bounds = array<i64: 128, 8>}, {pipeline_mode = #tpu.pipeline_mode<synchronous>, transform_indices = @transform_6, window_bounds = array<i64: 1, 8>}, {transform_indices = @transform_7, window_bounds = array<i64: 8, 8>}]} {
    %c0 = arith.constant 0 : index
    %c0_0 = arith.constant 0 : index
    %0 = vector.load %arg1[%c0, %c0_0] : memref<8x32xf32, #tpu.memory_space<vmem>>, vector<8x32xf32>
    %1 = arith.truncf %0 : vector<8x32xf32> to vector<8x32xbf16>
    %c0_1 = arith.constant 0 : index
    %c0_2 = arith.constant 0 : index
    %2 = vector.load %arg2[%c0_1, %c0_2] : memref<32x128xbf16, #tpu.memory_space<vmem>>, vector<32x128xbf16>
    %cst = arith.constant dense<0.000000e+00> : vector<8x128xf32>
    %3 = tpu.matmul %1, %2, %cst {dimension_numbers = #tpu.dot_dimension_numbers<[1], [0], [0], [1], [0, 0, 1, 1], [], []>} : vector<8x32xbf16>, vector<32x128xbf16>, vector<8x128xf32> -> vector<8x128xf32>
    %c0_3 = arith.constant 0 : index
    %c0_4 = arith.constant 0 : index
    %4 = vector.load %arg3[%c0_3, %c0_4] : memref<1x128xf32, #tpu.memory_space<vmem>>, vector<1x128xf32>
    %5 = vector.broadcast %4 : vector<1x128xf32> to vector<8x128xf32>
    %6 = arith.addf %3, %5 : vector<8x128xf32>
    %cst_5 = arith.constant 0.000000e+00 : f32
    %7 = vector.broadcast %cst_5 : f32 to vector<8x128xf32>
    %8 = arith.maximumf %6, %7 : vector<8x128xf32>
    %9 = arith.truncf %8 : vector<8x128xf32> to vector<8x128xbf16>
    %c0_6 = arith.constant 0 : index
    %c0_7 = arith.constant 0 : index
    %10 = vector.load %arg4[%c0_6, %c0_7] : memref<128x128xbf16, #tpu.memory_space<vmem>>, vector<128x128xbf16>
    %cst_8 = arith.constant dense<0.000000e+00> : vector<8x128xf32>
    %11 = tpu.matmul %9, %10, %cst_8 {dimension_numbers = #tpu.dot_dimension_numbers<[1], [0], [0], [1], [0, 0, 1, 1], [], []>} : vector<8x128xbf16>, vector<128x128xbf16>, vector<8x128xf32> -> vector<8x128xf32>
    %c0_9 = arith.constant 0 : index
    %c0_10 = arith.constant 0 : index
    %12 = vector.load %arg5[%c0_9, %c0_10] : memref<1x128xf32, #tpu.memory_space<vmem>>, vector<1x128xf32>
    %13 = vector.broadcast %12 : vector<1x128xf32> to vector<8x128xf32>
    %14 = arith.addf %11, %13 : vector<8x128xf32>
    %cst_11 = arith.constant 0.000000e+00 : f32
    %15 = vector.broadcast %cst_11 : f32 to vector<8x128xf32>
    %16 = arith.maximumf %14, %15 : vector<8x128xf32>
    %17 = arith.truncf %16 : vector<8x128xf32> to vector<8x128xbf16>
    %c0_12 = arith.constant 0 : index
    %c0_13 = arith.constant 0 : index
    %18 = vector.load %arg6[%c0_12, %c0_13] : memref<128x8xbf16, #tpu.memory_space<vmem>>, vector<128x8xbf16>
    %cst_14 = arith.constant dense<0.000000e+00> : vector<8x8xf32>
    %19 = tpu.matmul %17, %18, %cst_14 {dimension_numbers = #tpu.dot_dimension_numbers<[1], [0], [0], [1], [0, 0, 1, 1], [], []>} : vector<8x128xbf16>, vector<128x8xbf16>, vector<8x8xf32> -> vector<8x8xf32>
    %c0_15 = arith.constant 0 : index
    %c0_16 = arith.constant 0 : index
    %20 = vector.load %arg7[%c0_15, %c0_16] : memref<1x8xf32, #tpu.memory_space<vmem>>, vector<1x8xf32>
    %21 = vector.broadcast %20 : vector<1x8xf32> to vector<8x8xf32>
    %22 = arith.addf %19, %21 : vector<8x8xf32>
    %c0_17 = arith.constant 0 : index
    %c0_18 = arith.constant 0 : index
    %23 = vector.load %arg8[%c0_17, %c0_18] : memref<8x8xf32, #tpu.memory_space<vmem>>, vector<8x8xf32>
    tpu.vector_store %arg8[%c0_17, %c0_18], %22 {strides = array<i32>} : memref<8x8xf32, #tpu.memory_space<vmem>>, vector<8x8xf32>,
    return
  }
  func.func @transform_0(%arg0: i32) -> (i32, i32) {
    %c0_i32 = arith.constant 0 : i32
    %c0_i32_0 = arith.constant 0 : i32
    return %arg0, %c0_i32 : i32, i32
  }
  func.func @transform_1(%arg0: i32) -> (i32, i32) {
    %c0_i32 = arith.constant 0 : i32
    %c0_i32_0 = arith.constant 0 : i32
    %c0_i32_1 = arith.constant 0 : i32
    return %c0_i32, %c0_i32_0 : i32, i32
  }
  func.func @transform_2(%arg0: i32) -> (i32, i32) {
    %c0_i32 = arith.constant 0 : i32
    %c0_i32_0 = arith.constant 0 : i32
    %c0_i32_1 = arith.constant 0 : i32
    return %c0_i32, %c0_i32_0 : i32, i32
  }
  func.func @transform_3(%arg0: i32) -> (i32, i32) {
    %c0_i32 = arith.constant 0 : i32
    %c0_i32_0 = arith.constant 0 : i32
    %c0_i32_1 = arith.constant 0 : i32
    return %c0_i32, %c0_i32_0 : i32, i32
  }
  func.func @transform_4(%arg0: i32) -> (i32, i32) {
    %c0_i32 = arith.constant 0 : i32
    %c0_i32_0 = arith.constant 0 : i32
    %c0_i32_1 = arith.constant 0 : i32
    return %c0_i32, %c0_i32_0 : i32, i32
  }
  func.func @transform_5(%arg0: i32) -> (i32, i32) {
    %c0_i32 = arith.constant 0 : i32
    %c0_i32_0 = arith.constant 0 : i32
    %c0_i32_1 = arith.constant 0 : i32
    return %c0_i32, %c0_i32_0 : i32, i32
  }
  func.func @transform_6(%arg0: i32) -> (i32, i32) {
    %c0_i32 = arith.constant 0 : i32
    %c0_i32_0 = arith.constant 0 : i32
    %c0_i32_1 = arith.constant 0 : i32
    return %c0_i32, %c0_i32_0 : i32, i32
  }
  func.func @transform_7(%arg0: i32) -> (i32, i32) {
    %c0_i32 = arith.constant 0 : i32
    %c0_i32_0 = arith.constant 0 : i32
    return %arg0, %c0_i32 : i32, i32
  }
}

</mosaic_0001>

<bundles_post_ra>
// kernel: tpu_custom_call.1
= control target key start
LH: loop header
LB: loop body
LE: loop exit
PB: predicated region body
PF: predicated region fallthrough
CT: control target
= control target key end

     0   :  { %12 = vsyncpa [#allocation3], 0  ;;  %s671_s0 = inlined_call_operand.vmem [shape: f32[8,32], index: 0, kind: input, shape index: {}]   ;;  %s672_s1 = inlined_call_operand.hbm [shape: bf16[32,128], index: 1, kind: input, shape index: {}]   ;;  %s673_s2 = inlined_call_operand.vmem [shape: f32[1,128], index: 2, kind: input, shape index: {}]   ;;  %s674_s3 = inlined_call_operand.vmem [shape: bf16[128,128], index: 3, kind: input, shape index: {}]   ;;  %s675_s4 = inlined_call_operand.vmem [shape: f32[1,128], index: 4, kind: input, shape index: {}]   ;;  %s676_s5 = inlined_call_operand.vmem [shape: bf16[128,8], index: 5, kind: input, shape index: {}]   ;;  %s677_s6 = inlined_call_operand.vmem [shape: f32[1,8], index: 6, kind: input, shape index: {}]   ;;  %s678_s7 = inlined_call_operand.hbm [shape: f32[8,8], index: 7, kind: output, shape index: {}]  }
   0x1   :  { %13 = vsyncpa [#allocation4], 0  ;;  %s517_s24 = smov [#allocation2]   ;;  %s469_s28 = scalar_lea.hbm %s672_s1, 256 }
   0x2   :  { %s21_s25 = sshll.u32 %s517_s24, 4  ;;  %p470_p0 = scmp.ne.s32.totalorder %s672_s1, %s469_s28  ;;  %s22_s25 = int_to_ptr.vmem [resolvable:$true] %s21_s25 }
   0x3   :  { %p473_p1 = scmp.lt.u32.totalorder %s469_s28, %s672_s1 }
   0x5   :  { %p475_p2 = pnand %p473_p1, %p470_p0 }
   0x7   :  { %478 = shalt.err (!%p475_p2)
}
   0x8   :  { %s479_s10 = scalar_lea.vmem %s22_s25, 256  ;;  %p484_p4 = scmp.lt.s32.totalorder %s22_s25, %s22_s25 }
   0x9   :  { %p480_p3 = scmp.ne.s32.totalorder %s22_s25, %s479_s10  ;;  %p485_p5 = scmp.lt.s32.totalorder %s479_s10, %s479_s10 }
   0xb   :  { %p486_p6 = por %p485_p5, %p484_p4 }
   0xd   :  { %p487_p7 = pnand %p486_p6, %p480_p3 }
   0xf   :  { %490 = shalt.err (!%p487_p7)
}
  0x10   :  { %s518_s11 = smov 64   ;;  %s519_s12 = smov 4  }
  0x11   :  { %27 = dma.hbm_to_vmem [thread:$0]  %s672_s1, 256, %s22_s25, [#allocation3], %s518_s11, %s518_s11, %s519_s12  }
  0x12   :  { %513 = dma.done.wait [#allocation3], 256  }
  0x13   :  { %514 = vsyncadd [#allocation3], 4294967040  ;;  %v520_v0 = vmov 0.0   ;;  %vm521_vm0 = vmmov 0   ;;  %v451_v1 = vld [vmem:[#allocation2] sm:$0xff]   ;;  %v452_v2 = vld [vmem:[#allocation2 + $0x8] sm:$0xff]  }
  0x14   :  { %397 = vmatprep.subr.bf16.mxu0 %v520_v0  ;;  %401 = vmatprep.mubr.msk.bf16.mxu0 %vm521_vm0, %v520_v0  ;;  %v42_v3 = vld [vmem:[%s671_s0] sm:$0xff]  ;;  %v454_v6 = vld [vmem:[%s674_s3 + $0x8] sm:$0xff]   ;;  %vm67_vm1 = vcmask 261120   ;;  %v455_v7 = vld [vmem:[%s674_s3 + $0x10] sm:$0xff]   ;;  %s522_s26 = smov [#allocation5]   ;;  %vm337_vm2 = vcmask 64512  }
  0x15   :  { %405 = vmatprep.subr.bf16.mxu1 %v520_v0  ;;  %421 = vmatprep.mubr.msk.bf16.mxu1 %vm521_vm0, %v520_v0  ;;  %v453_v4 = vld [vmem:[%s674_s3] sm:$0xff]   ;;  %v43_v5 = vpack.c.bf16 %v42_v3, %v42_v3  ;;  %v456_v8 = vld [vmem:[%s674_s3 + $0x18] sm:$0xff]   ;;  %v458_v10 = vld [vmem:[%s674_s3 + $0x28] sm:$0xff]   ;;  %s345_s27 = sshll.u32 %s522_s26, 4  ;;  %s346_s27 = int_to_ptr.vmem [resolvable:$true] %s345_s27 }
  0x16   :  { %398 = vmatpush3.bf16.msra.mxu0 %v451_v1  ;;  %406 = vmatpush3.bf16.msra.mxu1 %v453_v4  ;;  %v457_v9 = vld [vmem:[%s674_s3 + $0x20] sm:$0xff]   ;;  %v459_v11 = vld [vmem:[%s674_s3 + $0x30] sm:$0xff]   ;;  %v460_v12 = vld [vmem:[%s674_s3 + $0x38] sm:$0xff]   ;;  %p496_p9 = scmp.lt.s32.totalorder %s346_s27, %s346_s27 }
  0x17   :  { %399 = vmatprep.subr.bf16.mxu0 %v520_v0  ;;  %407 = vmatprep.subr.bf16.mxu1 %v520_v0  ;;  %v461_v13 = vld [vmem:[%s676_s5] sm:$0xff]   ;;  %v462_v14 = vld [vmem:[%s676_s5 + $0x8] sm:$0xff]   ;;  %v463_v15 = vld [vmem:[%s676_s5 + $0x10] sm:$0xff]  }
  0x18   :  { %v464_v16 = vld [vmem:[%s676_s5 + $0x18] sm:$0xff]   ;;  %v465_v17 = vld [vmem:[%s676_s5 + $0x20] sm:$0xff]   ;;  %v466_v18 = vld [vmem:[%s676_s5 + $0x28] sm:$0xff]  }
  0x19   :  { %v354_v19 = vld [vmem:[%s673_s2] ss:$0 sm:$0xff]  ;;  %v467_v27 = vld [vmem:[%s676_s5 + $0x30] sm:$0xff]   ;;  %v468_v28 = vld [vmem:[%s676_s5 + $0x38] sm:$0xff]  }
  0x1a   :  { %400 = vmatpush3.bf16.msra.mxu0 %v452_v2  ;;  %408 = vmatpush3.bf16.msra.mxu1 %v454_v6  ;;  %v358_v29 = vld [vmem:[%s675_s4] ss:$0 sm:$0xff]  ;;  %s491_s4 = scalar_lea.vmem %s346_s27, 128 }
  0x1b   :  { %425 = vmatprep.subr.bf16.mxu0 %v520_v0  ;;  %409 = vmatprep.subr.bf16.mxu1 %v520_v0  ;;  %v367_v37 = vld [vmem:[%s677_s6] ss:$0 sm:$0xff]  ;;  %p492_p8 = scmp.ne.s32.totalorder %s346_s27, %s491_s4  ;;  %p497_p10 = scmp.lt.s32.totalorder %s491_s4, %s491_s4 }
  0x1d   :  { %402 = vmatmul.mubr.msk.bf16.vlgmr.msra.gmra.mrb[0].mxu0 %vm67_vm1, %v43_v5  ;;  %p498_p11 = por %p497_p10, %p496_p9 }
  0x1e   :  { %441 = vmatprep.mubr.msk.bf16.mxu0 %vm521_vm0, %v520_v0  ;;  %410 = vmatpush3.bf16.msra.mxu1 %v455_v7 }
  0x1f   :  { %411 = vmatprep.subr.bf16.mxu1 %v520_v0  ;;  %426 = vmatpush3.bf16.msra.mxu0 %v461_v13  ;;  %p499_p12 = pnand %p498_p11, %p492_p8 }
  0x20   :  { %427 = vmatprep.subr.bf16.mxu0 %v520_v0 }
  0x22   :  { %412 = vmatpush3.bf16.msra.mxu1 %v456_v8 }
  0x23   :  { %413 = vmatprep.subr.bf16.mxu1 %v520_v0  ;;  %428 = vmatpush3.bf16.msra.mxu0 %v462_v14 }
  0x24   :  { %429 = vmatprep.subr.bf16.mxu0 %v520_v0 }
  0x26   :  { %414 = vmatpush3.bf16.msra.mxu1 %v457_v9 }
  0x27   :  { %415 = vmatprep.subr.bf16.mxu1 %v520_v0  ;;  %430 = vmatpush3.bf16.msra.mxu0 %v463_v15 }
  0x28   :  { %431 = vmatprep.subr.bf16.mxu0 %v520_v0 }
  0x2a   :  { %416 = vmatpush3.bf16.msra.mxu1 %v458_v10 }
  0x2b   :  { %417 = vmatprep.subr.bf16.mxu1 %v520_v0  ;;  %432 = vmatpush3.bf16.msra.mxu0 %v464_v16 }
  0x2c   :  { %433 = vmatprep.subr.bf16.mxu0 %v520_v0 }
  0x2e   :  { %418 = vmatpush3.bf16.msra.mxu1 %v459_v11 }
  0x2f   :  { %419 = vmatprep.subr.bf16.mxu1 %v520_v0  ;;  %434 = vmatpush3.bf16.msra.mxu0 %v465_v17 }
  0x30   :  { %435 = vmatprep.subr.bf16.mxu0 %v520_v0 }
  0x32   :  { %420 = vmatpush3.bf16.msra.mxu1 %v460_v12 }
  0x33   :  { %436 = vmatpush3.bf16.msra.mxu0 %v466_v18 }
  0x34   :  { %437 = vmatprep.subr.bf16.mxu0 %v520_v0 }
  0x37   :  { %438 = vmatpush3.bf16.msra.mxu0 %v467_v27 }
  0x38   :  { %439 = vmatprep.subr.bf16.mxu0 %v520_v0 }
  0x3b   :  { %440 = vmatpush3.bf16.msra.mxu0 %v468_v28 }
  0xf0   :  { %v105_v20 = vpop.f32.mrb[0].mxu0 }
  0xf1   :  { %v106_v21 = vadd.f32 %v354_v19, %v105_v20  ;;  %v403_v22 = vpop.f32.mrb[1].mxu0 }
  0xf2   :  { %v108_v23 = vpop.f32.mrb[2].mxu0 }
  0xf3   :  { %v111_v24 = vmax.f32 %v106_v21, 0.0  ;;  %v404_v25 = vpop.f32.mrb[3].mxu0 }
  0xf5   :  { %v112_v26 = vpack.c.bf16 %v111_v24, %v111_v24 }
  0xf7   :  { %422 = vmatmul.mubr.bf16.vlgmr.msra.gmra.mrb[0].mxu1 %v112_v26 }
 0x1ca   :  { %v218_v30 = vpop.f32.mrb[0].mxu1 }
 0x1cb   :  { %v219_v31 = vadd.f32 %v358_v29, %v218_v30  ;;  %v423_v32 = vpop.f32.mrb[1].mxu1 }
 0x1cc   :  { %v221_v33 = vpop.f32.mrb[2].mxu1 }
 0x1cd   :  { %v224_v34 = vmax.f32 %v219_v31, 0.0  ;;  %v424_v35 = vpop.f32.mrb[3].mxu1 }
 0x1cf   :  { %v225_v36 = vpack.c.bf16 %v224_v34, %v224_v34 }
 0x1d1   :  { %442 = vmatmul.mubr.bf16.vlgmr.msra.gmra.mrb[4].mxu0 %v225_v36 }
 0x2a4   :  { %v331_v38 = vpop.f32.mrb[4].mxu0 }
 0x2a5   :  { %v332_v39 = vadd.f32 %v367_v37, %v331_v38  ;;  %v443_v40 = vpop.f32.mrb[5].mxu0 }
 0x2a6   :  { %v334_v41 = vpop.f32.mrb[6].mxu0 }
 0x2a7   :  { %v444_v42 = vpop.f32.mrb[7].mxu0  ;;  %338 = vst.msk [vmem:[#allocation5] sm:$0xff] %vm337_vm2, %v332_v39 }
 0x2a8   :  { %502 = shalt.err (!%p499_p12)
}
 0x2a9   :  { %s503_s6 = scalar_lea.hbm %s678_s7, 128 }
 0x2aa   :  { %p504_p13 = scmp.ne.s32.totalorder %s678_s7, %s503_s6  ;;  %p507_p0 = scmp.lt.u32.totalorder %s503_s6, %s678_s7 }
 0x2ac   :  { %p509_p1 = pnand %p507_p0, %p504_p13 }
 0x2ae   :  { %512 = shalt.err (!%p509_p1)
}
 0x2af   :  { %348 = dma.vmem_to_hbm [thread:$0]  %s346_s27, 128, %s678_s7, [#allocation4]  }
 0x2b0   :  { %515 = dma.done.wait [#allocation4], 128  }
 0x2b1   :  { %516 = vsyncadd [#allocation4], 4294967168 }
 0x2b2   :  { %352 = vsyncpa [#allocation3], 1 }
 0x2b3   :  { %353 = vsyncpa [#allocation4], 1 }

</bundles_post_ra>
